<compile_context>
chip_gen: v7x
topology: tpu7x:2x2x1
jax: 0.10.0
libtpu: 0.0.40
codegen_flags: <defaults>
</compile_context>

<pallas_src>
import jax
import jax.numpy as jnp
from jax import lax
from jax.experimental import pallas as pl
from jax.experimental.pallas import tpu as pltpu


HID_CHUNK = 512  # hidden-dim chunk; hidden is padded to a multiple of this


def _make_encoder_kernel(hid_chunk: int, bf16_tanh: bool):
    def kernel(x_ref, w1_ref, b1_ref, w2_ref, b2fb_ref, o_ref):
        # x: (TB, IN) f32, w1: (IN, Hp) bf16, b1: (1, Hp) f32,
        # w2: (Hp, E) bf16, b2fb: (2, E) f32 [row0=b2, row1=sigmoid(b2)],
        # o: (TB, E) f32
        x_bf = x_ref[...].astype(jnp.bfloat16)
        tb = x_ref.shape[0]
        e = o_ref.shape[1]
        n_chunks = w1_ref.shape[1] // hid_chunk

        def body(c, acc):
            off = pl.multiple_of(c * hid_chunk, hid_chunk)
            w1c = w1_ref[:, pl.ds(off, hid_chunk)]            # (IN, CHUNK) bf16
            b1c = b1_ref[:, pl.ds(off, hid_chunk)]            # (1, CHUNK) f32
            h = jnp.dot(x_bf, w1c, preferred_element_type=jnp.float32) + b1c
            if bf16_tanh:
                h16 = jnp.tanh(h.astype(jnp.bfloat16))        # bf16 EUP (v6e/v7x)
            else:
                h16 = jnp.tanh(h).astype(jnp.bfloat16)        # f32 EUP (v5e-safe)
            w2c = w2_ref[pl.ds(off, hid_chunk), :]            # (CHUNK, E) bf16
            return acc + jnp.dot(h16, w2c, preferred_element_type=jnp.float32)

        acc = lax.fori_loop(0, n_chunks, body,
                            jnp.zeros((tb, e), jnp.float32), unroll=True)
        z = acc + b2fb_ref[0:1, :]
        o_ref[...] = (jax.nn.sigmoid(z) - b2fb_ref[1:2, :]).astype(o_ref.dtype)

    return kernel


def prepare_params(p, w1, b1, w2, b2):
    """One-time prep: fold (1-p) into W1, pad hidden to a multiple of HID_CHUNK,
    cast weights to bf16, pack b2 together with sigmoid(b2)."""
    IN, H = w1.shape
    E = w2.shape[1]
    Hp = ((H + HID_CHUNK - 1) // HID_CHUNK) * HID_CHUNK       # 2000 -> 2048

    w1_eff = (1.0 - p)[:, None] * w1                          # fold eval-mode mask
    w1p = jnp.zeros((IN, Hp), jnp.float32).at[:, :H].set(w1_eff).astype(jnp.bfloat16)
    b1p = jnp.zeros((1, Hp), jnp.float32).at[:, :H].set(b1)
    # zero-padded W2 rows kill any contribution from padded hidden columns
    w2p = jnp.zeros((Hp, E), jnp.float32).at[:H, :].set(w2).astype(jnp.bfloat16)
    b2f = b2.reshape(1, E).astype(jnp.float32)
    b2fb = jnp.concatenate([b2f, jax.nn.sigmoid(b2f)], axis=0)  # (2, E)
    return w1p, b1p, w2p, b2fb


def _bf16_eup_ok() -> bool:
    """bf16 tanh only on chips with a bf16 EUP path (v6e / v7x)."""
    try:
        kind = jax.devices()[0].device_kind.lower()
    except Exception:
        return False
    return not any(v in kind for v in ("v2", "v3", "v4", "v5"))


def _choose_tb(B: int) -> int:
    if B <= 16:
        return B                                   # single full-extent block
    # >= 2 grid steps so ("parallel",) shards across v7x's two TensorCores;
    # cap at 512 rows (safe within v5e's 16 MiB scoped-VMEM default).
    half = (((B + 1) // 2) + 7) // 8 * 8           # ceil(B/2) rounded to 8 sublanes
    return min(half, 512)


def encoder_forward(x, w1p, b1p, w2p, b2fb):
    B, IN = x.shape
    Hp, E = w2p.shape
    TB = _choose_tb(B)
    kernel = _make_encoder_kernel(HID_CHUNK, _bf16_eup_ok())

    return pl.pallas_call(
        kernel,
        out_shape=jax.ShapeDtypeStruct((B, E), jnp.float32),
        grid=(pl.cdiv(B, TB),),                    # ragged final tile; no wrapper pad
        in_specs=[
            pl.BlockSpec((TB, IN), lambda i: (i, 0)),   # batch tile of x
            pl.BlockSpec((IN, Hp), lambda i: (0, 0)),   # W1 resident in VMEM
            pl.BlockSpec((1, Hp), lambda i: (0, 0)),
            pl.BlockSpec((Hp, E), lambda i: (0, 0)),    # W2 resident in VMEM
            pl.BlockSpec((2, E), lambda i: (0, 0)),     # [b2; sigmoid(b2)]
        ],
        out_specs=pl.BlockSpec((TB, E), lambda i: (i, 0)),
        compiler_params=pltpu.CompilerParams(
            dimension_semantics=("parallel",)),
    )(x, w1p, b1p, w2p, b2fb)


def reference_forward_f32(x, p, w1, b1, w2, b2):
    """Original module semantics in full f32."""
    xm = x * (1.0 - p)
    h = jnp.tanh(xm @ w1 + b1)
    y = jax.nn.sigmoid(h @ w2 + b2)
    return y - jax.nn.sigmoid(b2)


def reference_forward_prepared(x, w1p, b1p, w2p, b2fb, bf16_tanh=False):
    """Same bf16-weight math as the kernel (matches up to accumulation order)."""
    h = jnp.dot(x.astype(jnp.bfloat16), w1p,
                preferred_element_type=jnp.float32) + b1p
    if bf16_tanh:
        h16 = jnp.tanh(h.astype(jnp.bfloat16))
    else:
        h16 = jnp.tanh(h).astype(jnp.bfloat16)
    z = jnp.dot(h16, w2p, preferred_element_type=jnp.float32) + b2fb[0:1]
    return jax.nn.sigmoid(z) - b2fb[1:2]


if __name__ == "__main__":
    # Small shapes consistent with the module (hidden=2000 hardcoded by the module).
    B, IN, HIDDEN, EMB = 8, 32, 2000, 16

    key = jax.random.PRNGKey(0)
    kx, kp, kw1, kb1, kw2, kb2, kx2 = jax.random.split(key, 7)

    x = jax.random.normal(kx, (B, IN), dtype=jnp.float32)
    p = jax.random.uniform(kp, (IN,), dtype=jnp.float32)        # self.p = torch.rand(in_features)

    # Deterministic Linear-like init; weights stored pre-transposed as (in, out).
    lim1 = 1.0 / jnp.sqrt(jnp.float32(IN))
    w1 = jax.random.uniform(kw1, (IN, HIDDEN), jnp.float32, -lim1, lim1)
    b1 = jax.random.uniform(kb1, (HIDDEN,), jnp.float32, -lim1, lim1)
    lim2 = 1.0 / jnp.sqrt(jnp.float32(HIDDEN))
    w2 = jax.random.uniform(kw2, (HIDDEN, EMB), jnp.float32, -lim2, lim2)
    b2 = jax.random.uniform(kb2, (EMB,), jnp.float32, -lim2, lim2)

    params = prepare_params(p, w1, b1, w2, b2)
    bf16_tanh = _bf16_eup_ok()

    out = jax.block_until_ready(encoder_forward(x, *params))
    assert out.shape == (B, EMB)

    # Check 1: against identical bf16-weight / same-tanh-precision math.
    ref_exact = reference_forward_prepared(x, *params, bf16_tanh=bf16_tanh)
    assert jnp.allclose(out, ref_exact, atol=3e-3, rtol=0), "mismatch vs bf16 reference"

    # Check 2: semantic check against the original f32 module math
    # (tolerance covers bf16 weight/activation quantization).
    ref = reference_forward_f32(x, p, w1, b1, w2, b2)
    assert jnp.allclose(out, ref, atol=2.5e-2, rtol=0), "mismatch vs f32 reference"

    # Check 3: ragged-batch path (multi-step grid with a partial final tile).
    B2 = 20
    x2 = jax.random.normal(kx2, (B2, IN), dtype=jnp.float32)
    out2 = jax.block_until_ready(encoder_forward(x2, *params))
    assert out2.shape == (B2, EMB)
    ref2 = reference_forward_f32(x2, p, w1, b1, w2, b2)
    assert jnp.allclose(out2, ref2, atol=2.5e-2, rtol=0), "mismatch on ragged batch"

    print("KERNEL_OK")
</pallas_src>

<mosaic_0001>
module attributes {stable_mosaic.version = 11 : i64} {
  func.func @kernel(%arg0: i32, %arg1: memref<8x32xf32, #tpu.memory_space<vmem>>, %arg2: memref<32x2048xbf16, #tpu.memory_space<vmem>>, %arg3: memref<1x2048xf32, #tpu.memory_space<vmem>>, %arg4: memref<2048x16xbf16, #tpu.memory_space<vmem>>, %arg5: memref<2x16xf32, #tpu.memory_space<vmem>>, %arg6: memref<8x16xf32, #tpu.memory_space<vmem>>) attributes {dimension_semantics = [#tpu.dimension_semantics<parallel>], iteration_bounds = array<i64: 1>, scalar_prefetch = 0 : i64, scratch_operands = 0 : i64, tpu.core_type = #tpu.core_type<tc>, window_params = [{transform_indices = @transform_0, window_bounds = array<i64: 8, 32>}, {pipeline_mode = #tpu.pipeline_mode<synchronous>, transform_indices = @transform_1, window_bounds = array<i64: 32, 2048>}, {pipeline_mode = #tpu.pipeline_mode<synchronous>, transform_indices = @transform_2, window_bounds = array<i64: 1, 2048>}, {pipeline_mode = #tpu.pipeline_mode<synchronous>, transform_indices = @transform_3, window_bounds = array<i64: 2048, 16>}, {pipeline_mode = #tpu.pipeline_mode<synchronous>, transform_indices = @transform_4, window_bounds = array<i64: 2, 16>}, {transform_indices = @transform_5, window_bounds = array<i64: 8, 16>}]} {
    %c0 = arith.constant 0 : index
    %c0_0 = arith.constant 0 : index
    %0 = vector.load %arg1[%c0, %c0_0] : memref<8x32xf32, #tpu.memory_space<vmem>>, vector<8x32xf32>
    %1 = arith.truncf %0 : vector<8x32xf32> to vector<8x32xbf16>
    %cst = arith.constant 0.000000e+00 : f32
    %2 = vector.broadcast %cst : f32 to vector<8x16xf32>
    %c0_i32 = arith.constant 0 : i32
    %c512_i32 = arith.constant 512 : i32
    %3 = arith.muli %c0_i32, %c512_i32 : i32
    %4 = tpu.assume_multiple %3, 512 : i32
    %c0_1 = arith.constant 0 : index
    %5 = arith.index_cast %4 : i32 to index
    %6 = vector.load %arg2[%c0_1, %5] : memref<32x2048xbf16, #tpu.memory_space<vmem>>, vector<32x512xbf16>
    %c0_2 = arith.constant 0 : index
    %7 = arith.index_cast %4 : i32 to index
    %8 = vector.load %arg3[%c0_2, %7] : memref<1x2048xf32, #tpu.memory_space<vmem>>, vector<1x512xf32>
    %cst_3 = arith.constant dense<0.000000e+00> : vector<8x512xf32>
    %9 = tpu.matmul %1, %6, %cst_3 {dimension_numbers = #tpu.dot_dimension_numbers<[1], [0], [0], [1], [0, 0, 1, 1], [], []>} : vector<8x32xbf16>, vector<32x512xbf16>, vector<8x512xf32> -> vector<8x512xf32>
    %10 = vector.broadcast %8 : vector<1x512xf32> to vector<8x512xf32>
    %11 = arith.addf %9, %10 : vector<8x512xf32>
    %12 = arith.truncf %11 : vector<8x512xf32> to vector<8x512xbf16>
    %13 = math.tanh %12 : vector<8x512xbf16>
    %14 = arith.index_cast %4 : i32 to index
    %c0_4 = arith.constant 0 : index
    %15 = vector.load %arg4[%14, %c0_4] : memref<2048x16xbf16, #tpu.memory_space<vmem>>, vector<512x16xbf16>
    %cst_5 = arith.constant dense<0.000000e+00> : vector<8x16xf32>
    %16 = tpu.matmul %13, %15, %cst_5 {dimension_numbers = #tpu.dot_dimension_numbers<[1], [0], [0], [1], [0, 0, 1, 1], [], []>} : vector<8x512xbf16>, vector<512x16xbf16>, vector<8x16xf32> -> vector<8x16xf32>
    %17 = arith.addf %2, %16 : vector<8x16xf32>
    %c1_i32 = arith.constant 1 : i32
    %c512_i32_6 = arith.constant 512 : i32
    %18 = arith.muli %c1_i32, %c512_i32_6 : i32
    %19 = tpu.assume_multiple %18, 512 : i32
    %c0_7 = arith.constant 0 : index
    %20 = arith.index_cast %19 : i32 to index
    %21 = vector.load %arg2[%c0_7, %20] : memref<32x2048xbf16, #tpu.memory_space<vmem>>, vector<32x512xbf16>
    %c0_8 = arith.constant 0 : index
    %22 = arith.index_cast %19 : i32 to index
    %23 = vector.load %arg3[%c0_8, %22] : memref<1x2048xf32, #tpu.memory_space<vmem>>, vector<1x512xf32>
    %cst_9 = arith.constant dense<0.000000e+00> : vector<8x512xf32>
    %24 = tpu.matmul %1, %21, %cst_9 {dimension_numbers = #tpu.dot_dimension_numbers<[1], [0], [0], [1], [0, 0, 1, 1], [], []>} : vector<8x32xbf16>, vector<32x512xbf16>, vector<8x512xf32> -> vector<8x512xf32>
    %25 = vector.broadcast %23 : vector<1x512xf32> to vector<8x512xf32>
    %26 = arith.addf %24, %25 : vector<8x512xf32>
    %27 = arith.truncf %26 : vector<8x512xf32> to vector<8x512xbf16>
    %28 = math.tanh %27 : vector<8x512xbf16>
    %29 = arith.index_cast %19 : i32 to index
    %c0_10 = arith.constant 0 : index
    %30 = vector.load %arg4[%29, %c0_10] : memref<2048x16xbf16, #tpu.memory_space<vmem>>, vector<512x16xbf16>
    %cst_11 = arith.constant dense<0.000000e+00> : vector<8x16xf32>
    %31 = tpu.matmul %28, %30, %cst_11 {dimension_numbers = #tpu.dot_dimension_numbers<[1], [0], [0], [1], [0, 0, 1, 1], [], []>} : vector<8x512xbf16>, vector<512x16xbf16>, vector<8x16xf32> -> vector<8x16xf32>
    %32 = arith.addf %17, %31 : vector<8x16xf32>
    %c2_i32 = arith.constant 2 : i32
    %c512_i32_12 = arith.constant 512 : i32
    %33 = arith.muli %c2_i32, %c512_i32_12 : i32
    %34 = tpu.assume_multiple %33, 512 : i32
    %c0_13 = arith.constant 0 : index
    %35 = arith.index_cast %34 : i32 to index
    %36 = vector.load %arg2[%c0_13, %35] : memref<32x2048xbf16, #tpu.memory_space<vmem>>, vector<32x512xbf16>
    %c0_14 = arith.constant 0 : index
    %37 = arith.index_cast %34 : i32 to index
    %38 = vector.load %arg3[%c0_14, %37] : memref<1x2048xf32, #tpu.memory_space<vmem>>, vector<1x512xf32>
    %cst_15 = arith.constant dense<0.000000e+00> : vector<8x512xf32>
    %39 = tpu.matmul %1, %36, %cst_15 {dimension_numbers = #tpu.dot_dimension_numbers<[1], [0], [0], [1], [0, 0, 1, 1], [], []>} : vector<8x32xbf16>, vector<32x512xbf16>, vector<8x512xf32> -> vector<8x512xf32>
    %40 = vector.broadcast %38 : vector<1x512xf32> to vector<8x512xf32>
    %41 = arith.addf %39, %40 : vector<8x512xf32>
    %42 = arith.truncf %41 : vector<8x512xf32> to vector<8x512xbf16>
    %43 = math.tanh %42 : vector<8x512xbf16>
    %44 = arith.index_cast %34 : i32 to index
    %c0_16 = arith.constant 0 : index
    %45 = vector.load %arg4[%44, %c0_16] : memref<2048x16xbf16, #tpu.memory_space<vmem>>, vector<512x16xbf16>
    %cst_17 = arith.constant dense<0.000000e+00> : vector<8x16xf32>
    %46 = tpu.matmul %43, %45, %cst_17 {dimension_numbers = #tpu.dot_dimension_numbers<[1], [0], [0], [1], [0, 0, 1, 1], [], []>} : vector<8x512xbf16>, vector<512x16xbf16>, vector<8x16xf32> -> vector<8x16xf32>
    %47 = arith.addf %32, %46 : vector<8x16xf32>
    %c3_i32 = arith.constant 3 : i32
    %c512_i32_18 = arith.constant 512 : i32
    %48 = arith.muli %c3_i32, %c512_i32_18 : i32
    %49 = tpu.assume_multiple %48, 512 : i32
    %c0_19 = arith.constant 0 : index
    %50 = arith.index_cast %49 : i32 to index
    %51 = vector.load %arg2[%c0_19, %50] : memref<32x2048xbf16, #tpu.memory_space<vmem>>, vector<32x512xbf16>
    %c0_20 = arith.constant 0 : index
    %52 = arith.index_cast %49 : i32 to index
    %53 = vector.load %arg3[%c0_20, %52] : memref<1x2048xf32, #tpu.memory_space<vmem>>, vector<1x512xf32>
    %cst_21 = arith.constant dense<0.000000e+00> : vector<8x512xf32>
    %54 = tpu.matmul %1, %51, %cst_21 {dimension_numbers = #tpu.dot_dimension_numbers<[1], [0], [0], [1], [0, 0, 1, 1], [], []>} : vector<8x32xbf16>, vector<32x512xbf16>, vector<8x512xf32> -> vector<8x512xf32>
    %55 = vector.broadcast %53 : vector<1x512xf32> to vector<8x512xf32>
    %56 = arith.addf %54, %55 : vector<8x512xf32>
    %57 = arith.truncf %56 : vector<8x512xf32> to vector<8x512xbf16>
    %58 = math.tanh %57 : vector<8x512xbf16>
    %59 = arith.index_cast %49 : i32 to index
    %c0_22 = arith.constant 0 : index
    %60 = vector.load %arg4[%59, %c0_22] : memref<2048x16xbf16, #tpu.memory_space<vmem>>, vector<512x16xbf16>
    %cst_23 = arith.constant dense<0.000000e+00> : vector<8x16xf32>
    %61 = tpu.matmul %58, %60, %cst_23 {dimension_numbers = #tpu.dot_dimension_numbers<[1], [0], [0], [1], [0, 0, 1, 1], [], []>} : vector<8x512xbf16>, vector<512x16xbf16>, vector<8x16xf32> -> vector<8x16xf32>
    %62 = arith.addf %47, %61 : vector<8x16xf32>
    %c4_i32 = arith.constant 4 : i32
    %c0_24 = arith.constant 0 : index
    %c0_25 = arith.constant 0 : index
    %63 = vector.load %arg5[%c0_24, %c0_25] : memref<2x16xf32, #tpu.memory_space<vmem>>, vector<1x16xf32>
    %64 = vector.broadcast %63 : vector<1x16xf32> to vector<8x16xf32>
    %65 = arith.addf %62, %64 : vector<8x16xf32>
    %66 = arith.negf %65 : vector<8x16xf32>
    %67 = math.exp %66 : vector<8x16xf32>
    %cst_26 = arith.constant 1.000000e+00 : f32
    %68 = vector.broadcast %cst_26 : f32 to vector<8x16xf32>
    %69 = arith.addf %68, %67 : vector<8x16xf32>
    %70 = arith.divf %68, %69 : vector<8x16xf32>
    %c1 = arith.constant 1 : index
    %c0_27 = arith.constant 0 : index
    %71 = vector.load %arg5[%c1, %c0_27] : memref<2x16xf32, #tpu.memory_space<vmem>>, vector<1x16xf32>
    %72 = vector.broadcast %71 : vector<1x16xf32> to vector<8x16xf32>
    %73 = arith.subf %70, %72 : vector<8x16xf32>
    %c0_28 = arith.constant 0 : index
    %c0_29 = arith.constant 0 : index
    %74 = vector.load %arg6[%c0_28, %c0_29] : memref<8x16xf32, #tpu.memory_space<vmem>>, vector<8x16xf32>
    tpu.vector_store %arg6[%c0_28, %c0_29], %73 {strides = array<i32>} : memref<8x16xf32, #tpu.memory_space<vmem>>, vector<8x16xf32>,
    return
  }
  func.func @transform_0(%arg0: i32) -> (i32, i32) {
    %c0_i32 = arith.constant 0 : i32
    %c0_i32_0 = arith.constant 0 : i32
    return %arg0, %c0_i32 : i32, i32
  }
  func.func @transform_1(%arg0: i32) -> (i32, i32) {
    %c0_i32 = arith.constant 0 : i32
    %c0_i32_0 = arith.constant 0 : i32
    %c0_i32_1 = arith.constant 0 : i32
    return %c0_i32, %c0_i32_0 : i32, i32
  }
  func.func @transform_2(%arg0: i32) -> (i32, i32) {
    %c0_i32 = arith.constant 0 : i32
    %c0_i32_0 = arith.constant 0 : i32
    %c0_i32_1 = arith.constant 0 : i32
    return %c0_i32, %c0_i32_0 : i32, i32
  }
  func.func @transform_3(%arg0: i32) -> (i32, i32) {
    %c0_i32 = arith.constant 0 : i32
    %c0_i32_0 = arith.constant 0 : i32
    %c0_i32_1 = arith.constant 0 : i32
    return %c0_i32, %c0_i32_0 : i32, i32
  }
  func.func @transform_4(%arg0: i32) -> (i32, i32) {
    %c0_i32 = arith.constant 0 : i32
    %c0_i32_0 = arith.constant 0 : i32
    %c0_i32_1 = arith.constant 0 : i32
    return %c0_i32, %c0_i32_0 : i32, i32
  }
  func.func @transform_5(%arg0: i32) -> (i32, i32) {
    %c0_i32 = arith.constant 0 : i32
    %c0_i32_0 = arith.constant 0 : i32
    return %arg0, %c0_i32 : i32, i32
  }
}

</mosaic_0001>

<bundles_post_ra>
// kernel: tpu_custom_call.1
= control target key start
LH: loop header
LB: loop body
LE: loop exit
PB: predicated region body
PF: predicated region fallthrough
CT: control target
= control target key end

     0   :  { %v2813_v8 = vmov 0   ;;  %vm94_vm0 = vcmask 261120   ;;  %s3445_s0 = inlined_call_operand.vmem [shape: f32[8,32], index: 0, kind: input, shape index: {}]   ;;  %s3446_s1 = inlined_call_operand.vmem [shape: bf16[32,2048], index: 1, kind: input, shape index: {}]   ;;  %s3447_s2 = inlined_call_operand.vmem [shape: f32[1,2048], index: 2, kind: input, shape index: {}]   ;;  %s3448_s3 = inlined_call_operand.vmem [shape: bf16[2048,16], index: 3, kind: input, shape index: {}]   ;;  %s3449_s4 = inlined_call_operand.vmem [shape: f32[2,16], index: 4, kind: input, shape index: {}]   ;;  %s3450_s5 = inlined_call_operand.hbm [shape: f32[8,16], index: 5, kind: output, shape index: {}]  }
   0x1   :  { %v24_v0 = vld [vmem:[%s3446_s1] sm:$0xff]  ;;  %v25_v2 = vld [vmem:[%s3446_s1 + $0x8] sm:$0xff]  ;;  %130 = vmatprep.mubr.bf16.mxu0 %v2813_v8  ;;  %171 = vmatprep.mubr.bf16.mxu1 %v2813_v8  ;;  %v2067_v15 = vld [vmem:[%s3446_s1 + $0x10] sm:$0xff] }
   0x2   :  { %v26_v1 = vld [vmem:[%s3446_s1 + $0x40] sm:$0xff]  ;;  %v27_v4 = vld [vmem:[%s3446_s1 + $0x48] sm:$0xff]  ;;  %v2069_v16 = vld [vmem:[%s3446_s1 + $0x50] sm:$0xff] }
   0x3   :  { %v2058_v3 = vcombine.high %v24_v0, %v26_v1  ;;  %v2057_v5 = vcombine.low %v24_v0, %v26_v1  ;;  %v28_v6 = vld [vmem:[%s3446_s1 + $0x80] sm:$0xff]  ;;  %v2060_v9 = vcombine.high %v25_v2, %v27_v4  ;;  %v2059_v10 = vcombine.low %v25_v2, %v27_v4  ;;  %v29_v12 = vld [vmem:[%s3446_s1 + $0x88] sm:$0xff]  ;;  %v2068_v17 = vld [vmem:[%s3446_s1 + $0x18] sm:$0xff] }
   0x4   :  { %v30_v7 = vld [vmem:[%s3446_s1 + $0xc0] sm:$0xff]  ;;  %v31_v13 = vld [vmem:[%s3446_s1 + $0xc8] sm:$0xff]  ;;  %v2070_v20 = vld [vmem:[%s3446_s1 + $0x58] sm:$0xff]  ;;  %v2077_v22 = vcombine.high %v2067_v15, %v2069_v16  ;;  %v2076_v29 = vcombine.low %v2067_v15, %v2069_v16 }
   0x5   :  { %v2062_v11 = vcombine.high %v28_v6, %v30_v7  ;;  %98 = vmatprep.subr.bf16.mxu0 %v2058_v3  ;;  %v2064_v14 = vcombine.high %v29_v12, %v31_v13  ;;  %139 = vmatprep.subr.bf16.mxu1 %v2060_v9  ;;  %v2061_v18 = vcombine.low %v28_v6, %v30_v7  ;;  %v22_v19 = vld [vmem:[%s3445_s0] sm:$0xff]  ;;  %v2071_v23 = vld [vmem:[%s3446_s1 + $0x90] sm:$0xff]  ;;  %v2072_v26 = vld [vmem:[%s3446_s1 + $0x98] sm:$0xff] }
   0x6   :  { %99 = vmatpush1.bf16.msra.mxu0 %v2057_v5  ;;  %140 = vmatpush1.bf16.msra.mxu1 %v2059_v10  ;;  %v2063_v21 = vcombine.low %v29_v12, %v31_v13  ;;  %v2073_v24 = vld [vmem:[%s3446_s1 + $0xd0] sm:$0xff]  ;;  %v2079_v25 = vcombine.high %v2068_v17, %v2070_v20  ;;  %v2895_v27 = vpack.c.bf16 %v22_v19, %v22_v19  ;;  %v2074_v28 = vld [vmem:[%s3446_s1 + $0xd8] sm:$0xff]  ;;  %v2625_v35 = vld [vmem:[%s3448_s3 + $0x140] sm:$0xff]  }
   0x7   :  { %100 = vmatprep.subr.bf16.mxu0 %v2062_v11  ;;  %141 = vmatprep.subr.bf16.mxu1 %v2064_v14  ;;  %v2078_v30 = vcombine.low %v2068_v17, %v2070_v20  ;;  %v2081_v31 = vcombine.high %v2071_v23, %v2073_v24  ;;  %v2083_v32 = vcombine.high %v2072_v26, %v2074_v28  ;;  %v2626_v36 = vld [vmem:[%s3448_s3 + $0x1c0] sm:$0xff]   ;;  %v2629_v39 = vld [vmem:[%s3448_s3 + $0x148] sm:$0xff]  }
   0x8   :  { %v2080_v33 = vcombine.low %v2071_v23, %v2073_v24  ;;  %v2082_v34 = vcombine.low %v2072_v26, %v2074_v28  ;;  %v2627_v37 = vld [vmem:[%s3448_s3 + $0x100] sm:$0xff]   ;;  %v2630_v40 = vld [vmem:[%s3448_s3 + $0x1c8] sm:$0xff]  }
   0x9   :  { %v2628_v38 = vld [vmem:[%s3448_s3 + $0x180] sm:$0xff]   ;;  %v2631_v41 = vld [vmem:[%s3448_s3 + $0x108] sm:$0xff]  }
   0xa   :  { %101 = vmatpush1.bf16.msra.mxu0 %v2061_v18  ;;  %142 = vmatpush1.bf16.msra.mxu1 %v2063_v21  ;;  %v2632_v42 = vld [vmem:[%s3448_s3 + $0x188] sm:$0xff]  }
   0xb   :  { %324 = vmatprep.subr.bf16.mxu0 %v2077_v22  ;;  %365 = vmatprep.subr.bf16.mxu1 %v2079_v25 }
   0xd   :  { %2065 = vmatmul.mubr.msk.bf16.vlgmr.msra.gmra.mrb[0].mxu0 %vm94_vm0, %v2895_v27  ;;  %2066 = vmatmul.mubr.msk.bf16.vlgmr.msra.gmra.mrb[0].mxu1 %vm94_vm0, %v2895_v27 }
   0xe   :  { %325 = vmatpush1.bf16.msra.mxu0 %v2076_v29  ;;  %366 = vmatpush1.bf16.msra.mxu1 %v2078_v30 }
   0xf   :  { %326 = vmatprep.subr.bf16.mxu0 %v2081_v31  ;;  %367 = vmatprep.subr.bf16.mxu1 %v2083_v32 }
  0x10   :  { %356 = vmatprep.mubr.bf16.mxu0 %v2813_v8  ;;  %397 = vmatprep.mubr.bf16.mxu1 %v2813_v8 }
  0x12   :  { %327 = vmatpush1.bf16.msra.mxu0 %v2080_v33  ;;  %368 = vmatpush1.bf16.msra.mxu1 %v2082_v34 }
  0x13   :  { %2447 = vmatprep.subr.bf16.mxu0 %v2625_v35  ;;  %2469 = vmatprep.subr.bf16.mxu1 %v2626_v36 }
  0x15   :  { %2084 = vmatmul.mubr.msk.bf16.vlgmr.msra.gmra.mrb[4].mxu0 %vm94_vm0, %v2895_v27  ;;  %2085 = vmatmul.mubr.msk.bf16.vlgmr.msra.gmra.mrb[4].mxu1 %vm94_vm0, %v2895_v27 }
  0x16   :  { %2448 = vmatpush3.bf16.msra.mxu0 %v2627_v37  ;;  %2470 = vmatpush3.bf16.msra.mxu1 %v2628_v38 }
  0x17   :  { %2449 = vmatprep.subr.bf16.mxu0 %v2629_v39  ;;  %2471 = vmatprep.subr.bf16.mxu1 %v2630_v40 }
  0x1a   :  { %2450 = vmatpush3.bf16.msra.mxu0 %v2631_v41  ;;  %2472 = vmatpush3.bf16.msra.mxu1 %v2632_v42 }
  0x1b   :  { %10 = vsyncpa [#allocation3], 0  ;;  %v2633_v43 = vld [vmem:[%s3448_s3 + $0x150] sm:$0xff]   ;;  %v2637_v47 = vld [vmem:[%s3448_s3 + $0x158] sm:$0xff]   ;;  %v34_v5 = vlaneseq  ;;  %s2814_s10 = smov [#allocation2]   ;;  %vm2041_vm1 = vcmask 130048  }
  0x1c   :  { %v2634_v44 = vld [vmem:[%s3448_s3 + $0x1d0] sm:$0xff]   ;;  %2451 = vmatprep.subr.bf16.mxu0 %v2633_v43  ;;  %v2638_v48 = vld [vmem:[%s3448_s3 + $0x1d8] sm:$0xff]   ;;  %v2641_v51 = vld [vmem:[%s3448_s3 + $0x160] sm:$0xff]   ;;  %s2049_s11 = sshll.u32 %s2814_s10, 4  ;;  %s2050_s11 = int_to_ptr.vmem [resolvable:$true] %s2049_s11 }
  0x1d   :  { %v2635_v45 = vld [vmem:[%s3448_s3 + $0x110] sm:$0xff]   ;;  %2473 = vmatprep.subr.bf16.mxu1 %v2634_v44  ;;  %v2639_v49 = vld [vmem:[%s3448_s3 + $0x118] sm:$0xff]   ;;  %v2642_v52 = vld [vmem:[%s3448_s3 + $0x1e0] sm:$0xff]   ;;  %v35_v6 = vshrl.u32 %v34_v5, 7  ;;  %s2789_s12 = scalar_lea.vmem %s2050_s11, 128  ;;  %p2794_p1 = scmp.lt.s32.totalorder %s2050_s11, %s2050_s11 }
  0x1e   :  { %v2636_v46 = vld [vmem:[%s3448_s3 + $0x190] sm:$0xff]   ;;  %2452 = vmatpush3.bf16.msra.mxu0 %v2635_v45  ;;  %v2640_v50 = vld [vmem:[%s3448_s3 + $0x198] sm:$0xff]   ;;  %v2643_v53 = vld [vmem:[%s3448_s3 + $0x120] sm:$0xff]   ;;  %p2790_p0 = scmp.ne.s32.totalorder %s2050_s11, %s2789_s12  ;;  %p2795_p2 = scmp.lt.s32.totalorder %s2789_s12, %s2789_s12 }
  0x1f   :  { %2474 = vmatpush3.bf16.msra.mxu1 %v2636_v46  ;;  %2453 = vmatprep.subr.bf16.mxu0 %v2637_v47  ;;  %v2644_v54 = vld [vmem:[%s3448_s3 + $0x1a0] sm:$0xff]   ;;  %v2645_v55 = vld [vmem:[%s3448_s3 + $0x168] sm:$0xff]   ;;  %v2649_v59 = vld [vmem:[%s3448_s3 + $0x170] sm:$0xff]   ;;  %v3016_v11 = vsub.s32 1, %v35_v6  ;;  %v3026_v16 = vsub.s32 0, %v35_v6  ;;  %v3028_v17 = vsub.s32 3, %v35_v6 }
  0x20   :  { %2475 = vmatprep.subr.bf16.mxu1 %v2638_v48  ;;  %v2646_v56 = vld [vmem:[%s3448_s3 + $0x1e8] sm:$0xff]   ;;  %v2650_v60 = vld [vmem:[%s3448_s3 + $0x1f0] sm:$0xff]   ;;  %v2653_v63 = vld [vmem:[%s3448_s3 + $0x178] sm:$0xff]   ;;  %v3030_v20 = vsub.s32 2, %v35_v6  ;;  %p2796_p3 = por %p2795_p2, %p2794_p1 }
  0x21   :  { %v2647_v57 = vld [vmem:[%s3448_s3 + $0x128] sm:$0xff]   ;;  %v2651_v61 = vld [vmem:[%s3448_s3 + $0x130] sm:$0xff]   ;;  %v2654_v0 = vld [vmem:[%s3448_s3 + $0x1f8] sm:$0xff]  }
  0x22   :  { %2454 = vmatpush3.bf16.msra.mxu0 %v2639_v49  ;;  %v2648_v58 = vld [vmem:[%s3448_s3 + $0x1a8] sm:$0xff]   ;;  %v2652_v62 = vld [vmem:[%s3448_s3 + $0x1b0] sm:$0xff]   ;;  %v2655_v1 = vld [vmem:[%s3448_s3 + $0x138] sm:$0xff]   ;;  %p2797_p4 = pnand %p2796_p3, %p2790_p0 }
  0x23   :  { %2476 = vmatpush3.bf16.msra.mxu1 %v2640_v50  ;;  %2455 = vmatprep.subr.bf16.mxu0 %v2641_v51  ;;  %v2656_v2 = vld [vmem:[%s3448_s3 + $0x1b8] sm:$0xff]   ;;  %v2657_v3 = vld [vmem:[%s3448_s3 + $0x40] sm:$0xff]  }
  0x24   :  { %2477 = vmatprep.subr.bf16.mxu1 %v2642_v52  ;;  %v2658_v4 = vld [vmem:[%s3448_s3 + $0xc0] sm:$0xff]   ;;  %v2671_v5 = vld [vmem:[%s3448_s3 + $0x18] sm:$0xff]  }
  0x25   :  { %v2075_v14 = vld [vmem:[%s3447_s2 + $0x4] sm:$0xf]  ;;  %v3024_v15 = vld [vmem:[%s3447_s2] sm:$0xf]  ;;  %v2672_v6 = vld [vmem:[%s3448_s3 + $0x98] sm:$0xff]  }
  0x26   :  { %2456 = vmatpush3.bf16.msra.mxu0 %v2643_v53  ;;  %v267_v22 = vrot.slane %v2075_v14, %v3026_v16  ;;  %v41_v23 = vrot.slane %v3024_v15, %v3016_v11  ;;  %v275_v24 = vrot.slane %v2075_v14, %v3030_v20  ;;  %v271_v25 = vrot.slane %v2075_v14, %v3016_v11  ;;  %v2659_v50 = vld [vmem:[%s3448_s3] sm:$0xff]  }
  0x27   :  { %2478 = vmatpush3.bf16.msra.mxu1 %v2644_v54  ;;  %2457 = vmatprep.subr.bf16.mxu0 %v2645_v55  ;;  %v49_v26 = vrot.slane %v3024_v15, %v3028_v17  ;;  %v279_v28 = vrot.slane %v2075_v14, %v3028_v17  ;;  %v2660_v52 = vld [vmem:[%s3448_s3 + $0x80] sm:$0xff]   ;;  %v2661_v54 = vld [vmem:[%s3448_s3 + $0x48] sm:$0xff]  }
  0x28   :  { %2479 = vmatprep.subr.bf16.mxu1 %v2646_v56  ;;  %v2662_v56 = vld [vmem:[%s3448_s3 + $0xc8] sm:$0xff]  }
  0x2a   :  { %2458 = vmatpush3.bf16.msra.mxu0 %v2647_v57 }
  0x2b   :  { %2480 = vmatpush3.bf16.msra.mxu1 %v2648_v58  ;;  %2459 = vmatprep.subr.bf16.mxu0 %v2649_v59  ;;  %v2663_v58 = vld [vmem:[%s3448_s3 + $0x8] sm:$0xff]  }
  0x2c   :  { %2481 = vmatprep.subr.bf16.mxu1 %v2650_v60  ;;  %v2664_v60 = vld [vmem:[%s3448_s3 + $0x88] sm:$0xff]  }
  0x2e   :  { %2460 = vmatpush3.bf16.msra.mxu0 %v2651_v61  ;;  %v2665_v61 = vld [vmem:[%s3448_s3 + $0x50] sm:$0xff]  }
  0x2f   :  { %2482 = vmatpush3.bf16.msra.mxu1 %v2652_v62  ;;  %2461 = vmatprep.subr.bf16.mxu0 %v2653_v63  ;;  %v2666_v62 = vld [vmem:[%s3448_s3 + $0xd0] sm:$0xff]  }
  0x30   :  { %2483 = vmatprep.subr.bf16.mxu1 %v2654_v0  ;;  %v2667_v63 = vld [vmem:[%s3448_s3 + $0x10] sm:$0xff]  }
  0x31   :  { %v2668_v0 = vld [vmem:[%s3448_s3 + $0x90] sm:$0xff]  }
  0x32   :  { %2462 = vmatpush3.bf16.msra.mxu0 %v2655_v1  ;;  %v2669_v1 = vld [vmem:[%s3448_s3 + $0x58] sm:$0xff]  }
  0x33   :  { %2484 = vmatpush3.bf16.msra.mxu1 %v2656_v2  ;;  %2491 = vmatprep.subr.bf16.mxu0 %v2657_v3  ;;  %v2670_v2 = vld [vmem:[%s3448_s3 + $0xd8] sm:$0xff]   ;;  %v37_v3 = vrot.slane %v3024_v15, %v3026_v16 }
  0x34   :  { %2513 = vmatprep.subr.bf16.mxu1 %v2658_v4  ;;  %v45_v4 = vrot.slane %v3024_v15, %v3030_v20  ;;  %v2675_v15 = vld [vmem:[%s3448_s3 + $0x20] sm:$0xff]  }
  0xe0   :  { %v3012_v7 = vpop.f32.mrb[0].mxu0  ;;  %v3014_v9 = vpop.f32.mrb[0].mxu1 }
  0xe1   :  { %v134_v10 = vpop.f32.mrb[1].mxu0  ;;  %v175_v12 = vpop.f32.mrb[1].mxu1  ;;  %v174_v14 = vadd.f32 %v3014_v9, %v45_v4  ;;  %v2706_v4 = vld [vmem:[%s3448_s3 + $0x2e0] sm:$0xff]  }
  0xe2   :  { %v136_v13 = vpop.f32.mrb[2].mxu0  ;;  %v177_v18 = vpop.f32.mrb[2].mxu1  ;;  %v135_v33 = vadd.f32 %v134_v10, %v41_v23  ;;  %v176_v38 = vadd.f32 %v175_v12, %v49_v26  ;;  %v2673_v10 = vld [vmem:[%s3448_s3 + $0x60] sm:$0xff]   ;;  %v2680_v23 = vld [vmem:[%s3448_s3 + $0xa8] sm:$0xff]   ;;  %v2683_v26 = vld [vmem:[%s3448_s3 + $0x30] sm:$0xff]  }
  0xe3   :  { %v137_v19 = vpop.f32.mrb[3].mxu0  ;;  %v178_v21 = vpop.f32.mrb[3].mxu1  ;;  %v2674_v12 = vld [vmem:[%s3448_s3 + $0xe0] sm:$0xff]   ;;  %v133_v13 = vadd.f32 %v3012_v7, %v37_v3  ;;  %v2678_v7 = vld [vmem:[%s3448_s3 + $0xe8] sm:$0xff]  }
  0xe4   :  { %v181_v47 = vpack.c.bf16 %v135_v33, %v135_v33  ;;  %v183_v48 = vpack.c.bf16 %v176_v38, %v176_v38  ;;  %v2676_v18 = vld [vmem:[%s3448_s3 + $0xa0] sm:$0xff]   ;;  %v2677_v19 = vld [vmem:[%s3448_s3 + $0x68] sm:$0xff]   ;;  %v182_v21 = vpack.c.bf16 %v174_v14, %v174_v14 }
  0xe5   :  { %v180_v9 = vpack.c.bf16 %v133_v13, %v133_v13  ;;  %v2215_v33 = vld [vmem:[%s3446_s1 + $0x28] sm:$0xff]  ;;  %v2705_v3 = vld [vmem:[%s3448_s3 + $0x260] sm:$0xff]  }
  0xe6   :  { %v2711_v13 = vld [vmem:[%s3448_s3 + $0x228] sm:$0xff]  }
  0xe7   :  { %v2712_v14 = vld [vmem:[%s3448_s3 + $0x2a8] sm:$0xff]  }
  0xe8   :  { %v358_v29 = vpop.f32.mrb[4].mxu0  ;;  %v399_v31 = vpop.f32.mrb[4].mxu1 }
  0xe9   :  { %v359_v30 = vadd.f32 %v358_v29, %v267_v22  ;;  %v360_v32 = vpop.f32.mrb[5].mxu0  ;;  %v400_v34 = vadd.f32 %v399_v31, %v275_v24  ;;  %v401_v36 = vpop.f32.mrb[5].mxu1  ;;  %v2679_v22 = vld [vmem:[%s3448_s3 + $0x28] sm:$0xff]   ;;  %v2681_v24 = vld [vmem:[%s3448_s3 + $0x70] sm:$0xff]   ;;  %v2685_v29 = vld [vmem:[%s3448_s3 + $0x78] sm:$0xff]  }
  0xea   :  { %v361_v35 = vadd.f32 %v360_v32, %v271_v25  ;;  %v362_v37 = vpop.f32.mrb[6].mxu0  ;;  %v402_v40 = vadd.f32 %v401_v36, %v279_v28  ;;  %v403_v41 = vpop.f32.mrb[6].mxu1  ;;  %v2682_v25 = vld [vmem:[%s3448_s3 + $0xf0] sm:$0xff]   ;;  %v2214_v31 = vld [vmem:[%s3446_s1 + $0x20] sm:$0xff]  ;;  %v2688_v36 = vld [vmem:[%s3448_s3 + $0xb8] sm:$0xff]  }
  0xeb   :  { %v406_v39 = vpack.c.bf16 %v359_v30, %v359_v30  ;;  %v363_v42 = vpop.f32.mrb[7].mxu0  ;;  %v404_v44 = vpop.f32.mrb[7].mxu1  ;;  %v408_v45 = vpack.c.bf16 %v400_v34, %v400_v34  ;;  %v2684_v28 = vld [vmem:[%s3448_s3 + $0xb0] sm:$0xff]   ;;  %v2686_v30 = vld [vmem:[%s3448_s3 + $0xf8] sm:$0xff]   ;;  %v2216_v32 = vld [vmem:[%s3446_s1 + $0x60] sm:$0xff] }
  0xec   :  { %v407_v43 = vpack.c.bf16 %v361_v35, %v361_v35  ;;  %v409_v46 = vpack.c.bf16 %v402_v40, %v402_v40  ;;  %v2217_v34 = vld [vmem:[%s3446_s1 + $0x68] sm:$0xff]  ;;  %v2687_v35 = vld [vmem:[%s3448_s3 + $0x38] sm:$0xff]   ;;  %v2224_v37 = vcombine.high %v2214_v31, %v2216_v32  ;;  %v2220_v40 = vld [vmem:[%s3446_s1 + $0xe0] sm:$0xff] }
  0xed   :  { %2753 = vtanh.bf16 %v406_v39  ;;  %v2226_v38 = vcombine.high %v2215_v33, %v2217_v34  ;;  %v2218_v39 = vld [vmem:[%s3446_s1 + $0xa0] sm:$0xff]  ;;  %v2219_v41 = vld [vmem:[%s3446_s1 + $0xa8] sm:$0xff]  ;;  %v2225_v44 = vcombine.low %v2215_v33, %v2217_v34 }
  0xee   :  { %2755 = vtanh.bf16 %v407_v43  ;;  %v2221_v42 = vld [vmem:[%s3446_s1 + $0xe8] sm:$0xff]  ;;  %v2223_v43 = vcombine.low %v2214_v31, %v2216_v32 }
  0xef   :  { %2757 = vtanh.bf16 %v409_v46 }
  0xf0   :  { %2759 = vtanh.bf16 %v408_v45  ;;  %v2228_v45 = vcombine.high %v2218_v39, %v2220_v40 }
  0xf1   :  { %2761 = vtanh.bf16 %v181_v47  ;;  %v2230_v47 = vcombine.high %v2219_v41, %v2221_v42 }
  0xf2   :  { %2763 = vtanh.bf16 %v183_v48 }
  0xf3   :  { %2765 = vtanh.bf16 %v180_v9  ;;  %v2717_v9 = vld [vmem:[%s3448_s3 + $0x278] sm:$0xff]  }
  0xf4   :  { %2767 = vtanh.bf16 %v182_v21  ;;  %v2718_v21 = vld [vmem:[%s3448_s3 + $0x2f8] sm:$0xff]  }
  0xf8   :  { %v2754_v49 = vpop.eup %2753 }
  0xf9   :  { %v2756_v51 = vpop.eup %2755 }
  0xfa   :  { %v2758_v53 = vpop.eup %2757  ;;  %703 = vmatprep.mubr.bf16.mxu0 %v2756_v51  ;;  %v2689_v51 = vld [vmem:[%s3448_s3 + $0x240] sm:$0xff]  }
  0xfb   :  { %v2760_v55 = vpop.eup %2759  ;;  %743 = vmatprep.mubr.bf16.mxu1 %v2758_v53  ;;  %704 = vmatmul.mubr.bf16.vlgmr.msra.gmra.mrb[8].mxu0 %v2754_v49  ;;  %v2227_v49 = vcombine.low %v2218_v39, %v2220_v40  ;;  %v2691_v53 = vld [vmem:[%s3448_s3 + $0x200] sm:$0xff]  }
  0xfc   :  { %v2762_v57 = vpop.eup %2761  ;;  %744 = vmatmul.mubr.bf16.vlgmr.msra.gmra.mrb[8].mxu1 %v2760_v55  ;;  %2492 = vmatpush3.bf16.msra.mxu0 %v2659_v50  ;;  %v2229_v50 = vcombine.low %v2219_v41, %v2221_v42  ;;  %v2693_v55 = vld [vmem:[%s3448_s3 + $0x248] sm:$0xff]  }
  0xfd   :  { %v2764_v59 = vpop.eup %2763  ;;  %2514 = vmatpush3.bf16.msra.mxu1 %v2660_v52  ;;  %975 = vmatprep.mubr.bf16.mxu0 %v2762_v57  ;;  %v2690_v52 = vld [vmem:[%s3448_s3 + $0x2c0] sm:$0xff]   ;;  %v2695_v57 = vld [vmem:[%s3448_s3 + $0x208] sm:$0xff]  }
  0xfe   :  { %1015 = vmatprep.mubr.bf16.mxu1 %v2764_v59  ;;  %2493 = vmatprep.subr.bf16.mxu0 %v2661_v54  ;;  %v2766_v46 = vpop.eup %2765  ;;  %v2692_v54 = vld [vmem:[%s3448_s3 + $0x280] sm:$0xff]   ;;  %v2697_v59 = vld [vmem:[%s3448_s3 + $0x250] sm:$0xff]  }
  0xff   :  { %2515 = vmatprep.subr.bf16.mxu1 %v2662_v56  ;;  %v2768_v48 = vpop.eup %2767  ;;  %v2694_v56 = vld [vmem:[%s3448_s3 + $0x2c8] sm:$0xff]  }
 0x100   :  { %2494 = vmatpush3.bf16.msra.mxu0 %v2663_v58  ;;  %v2696_v58 = vld [vmem:[%s3448_s3 + $0x288] sm:$0xff]  }
 0x101   :  { %2516 = vmatpush3.bf16.msra.mxu1 %v2664_v60  ;;  %2495 = vmatprep.subr.bf16.mxu0 %v2665_v61  ;;  %v2698_v60 = vld [vmem:[%s3448_s3 + $0x2d0] sm:$0xff]  }
 0x102   :  { %2517 = vmatprep.subr.bf16.mxu1 %v2666_v62  ;;  %v2699_v61 = vld [vmem:[%s3448_s3 + $0x210] sm:$0xff]  }
 0x103   :  { %v2700_v62 = vld [vmem:[%s3448_s3 + $0x290] sm:$0xff]  }
 0x104   :  { %2496 = vmatpush3.bf16.msra.mxu0 %v2667_v63  ;;  %v2701_v63 = vld [vmem:[%s3448_s3 + $0x258] sm:$0xff]  }
 0x105   :  { %2518 = vmatpush3.bf16.msra.mxu1 %v2668_v0  ;;  %2497 = vmatprep.subr.bf16.mxu0 %v2669_v1  ;;  %v2702_v0 = vld [vmem:[%s3448_s3 + $0x2d8] sm:$0xff]  }
 0x106   :  { %2519 = vmatprep.subr.bf16.mxu1 %v2670_v2  ;;  %v2703_v1 = vld [vmem:[%s3448_s3 + $0x218] sm:$0xff]  }
 0x107   :  { %v2704_v2 = vld [vmem:[%s3448_s3 + $0x298] sm:$0xff]  }
 0x108   :  { %2498 = vmatpush3.bf16.msra.mxu0 %v2671_v5  ;;  %v2707_v5 = vld [vmem:[%s3448_s3 + $0x220] sm:$0xff]  }
 0x109   :  { %2520 = vmatpush3.bf16.msra.mxu1 %v2672_v6  ;;  %2499 = vmatprep.subr.bf16.mxu0 %v2673_v10  ;;  %v2708_v6 = vld [vmem:[%s3448_s3 + $0x2a0] sm:$0xff]   ;;  %v2709_v10 = vld [vmem:[%s3448_s3 + $0x268] sm:$0xff]  }
 0x10a   :  { %2521 = vmatprep.subr.bf16.mxu1 %v2674_v12  ;;  %v2710_v12 = vld [vmem:[%s3448_s3 + $0x2e8] sm:$0xff]  }
 0x10c   :  { %2500 = vmatpush3.bf16.msra.mxu0 %v2675_v15  ;;  %v2713_v15 = vld [vmem:[%s3448_s3 + $0x270] sm:$0xff]  }
 0x10d   :  { %2522 = vmatpush3.bf16.msra.mxu1 %v2676_v18  ;;  %2501 = vmatprep.subr.bf16.mxu0 %v2677_v19  ;;  %v2714_v18 = vld [vmem:[%s3448_s3 + $0x2f0] sm:$0xff]  }
 0x10e   :  { %2523 = vmatprep.subr.bf16.mxu1 %v2678_v7  ;;  %v2715_v19 = vld [vmem:[%s3448_s3 + $0x230] sm:$0xff]  }
 0x10f   :  { %v2716_v7 = vld [vmem:[%s3448_s3 + $0x2b0] sm:$0xff]  }
 0x110   :  { %2502 = vmatpush3.bf16.msra.mxu0 %v2679_v22  ;;  %v2719_v22 = vld [vmem:[%s3448_s3 + $0x238] sm:$0xff]  }
 0x111   :  { %2524 = vmatpush3.bf16.msra.mxu1 %v2680_v23  ;;  %2503 = vmatprep.subr.bf16.mxu0 %v2681_v24  ;;  %v2720_v23 = vld [vmem:[%s3448_s3 + $0x2b8] sm:$0xff]   ;;  %v3265_v24 = vld [vmem:[%s3446_s1 + $0x30] sm:$0xff] }
 0x112   :  { %2525 = vmatprep.subr.bf16.mxu1 %v2682_v25  ;;  %v3270_v25 = vld [vmem:[%s3446_s1 + $0x70] sm:$0xff] }
 0x114   :  { %2504 = vmatpush3.bf16.msra.mxu0 %v2683_v26  ;;  %v3275_v26 = vld [vmem:[%s3446_s1 + $0x38] sm:$0xff] }
 0x115   :  { %2526 = vmatpush3.bf16.msra.mxu1 %v2684_v28  ;;  %2505 = vmatprep.subr.bf16.mxu0 %v2685_v29  ;;  %v2339_v28 = vcombine.high %v3265_v24, %v3270_v25  ;;  %v3282_v29 = vld [vmem:[%s3446_s1 + $0x78] sm:$0xff] }
 0x116   :  { %2527 = vmatprep.subr.bf16.mxu1 %v2686_v30  ;;  %v2338_v30 = vcombine.low %v3265_v24, %v3270_v25  ;;  %v2340_v31 = vcombine.low %v3275_v26, %v3282_v29  ;;  %v2341_v32 = vcombine.high %v3275_v26, %v3282_v29  ;;  %v2723_v24 = vld [vmem:[%s3448_s3 + $0x300] sm:$0xff]   ;;  %v2725_v26 = vld [vmem:[%s3448_s3 + $0x348] sm:$0xff]  }
 0x117   :  { %v2724_v25 = vld [vmem:[%s3448_s3 + $0x380] sm:$0xff]   ;;  %v2727_v29 = vld [vmem:[%s3448_s3 + $0x308] sm:$0xff]  }
 0x118   :  { %2506 = vmatpush3.bf16.msra.mxu0 %v2687_v35 }
 0x119   :  { %2528 = vmatpush3.bf16.msra.mxu1 %v2688_v36  ;;  %1095 = vmatprep.subr.bf16.mxu0 %v2224_v37 }
 0x11a   :  { %1136 = vmatprep.subr.bf16.mxu1 %v2226_v38 }
 0x11b   :  { %976 = vmatmul.mubr.bf16.vlgmr.msra.gmra.mrb[12].mxu0 %v2766_v46 }
 0x11c   :  { %1016 = vmatmul.mubr.bf16.vlgmr.msra.gmra.mrb[12].mxu1 %v2768_v48  ;;  %1096 = vmatpush1.bf16.msra.mxu0 %v2223_v43 }
 0x11d   :  { %1137 = vmatpush1.bf16.msra.mxu1 %v2225_v44  ;;  %1097 = vmatprep.subr.bf16.mxu0 %v2228_v45 }
 0x11e   :  { %1138 = vmatprep.subr.bf16.mxu1 %v2230_v47  ;;  %1127 = vmatprep.mubr.bf16.mxu0 %v2813_v8 }
 0x11f   :  { %1168 = vmatprep.mubr.bf16.mxu1 %v2813_v8 }
 0x120   :  { %1098 = vmatpush1.bf16.msra.mxu0 %v2227_v49 }
 0x121   :  { %1139 = vmatpush1.bf16.msra.mxu1 %v2229_v50  ;;  %2535 = vmatprep.subr.bf16.mxu0 %v2689_v51  ;;  %v2222_v50 = vld [vmem:[%s3447_s2 + $0x8] sm:$0xf] }
 0x122   :  { %2557 = vmatprep.subr.bf16.mxu1 %v2690_v52 }
 0x123   :  { %2231 = vmatmul.mubr.msk.bf16.vlgmr.msra.gmra.mrb[16].mxu0 %vm94_vm0, %v2895_v27 }
 0x124   :  { %2232 = vmatmul.mubr.msk.bf16.vlgmr.msra.gmra.mrb[16].mxu1 %vm94_vm0, %v2895_v27  ;;  %2536 = vmatpush3.bf16.msra.mxu0 %v2691_v53 }
 0x125   :  { %2558 = vmatpush3.bf16.msra.mxu1 %v2692_v54  ;;  %2537 = vmatprep.subr.bf16.mxu0 %v2693_v55 }
 0x126   :  { %2559 = vmatprep.subr.bf16.mxu1 %v2694_v56  ;;  %v1038_v56 = vrot.slane %v2222_v50, %v3026_v16 }
 0x128   :  { %2538 = vmatpush3.bf16.msra.mxu0 %v2695_v57 }
 0x129   :  { %2560 = vmatpush3.bf16.msra.mxu1 %v2696_v58  ;;  %2539 = vmatprep.subr.bf16.mxu0 %v2697_v59  ;;  %v1046_v58 = vrot.slane %v2222_v50, %v3030_v20  ;;  %v1042_v59 = vrot.slane %v2222_v50, %v3016_v11 }
 0x12a   :  { %2561 = vmatprep.subr.bf16.mxu1 %v2698_v60  ;;  %v1050_v60 = vrot.slane %v2222_v50, %v3028_v17  ;;  %v2742_v50 = vld [vmem:[%s3448_s3 + $0x3e8] sm:$0xff]  }
 0x12c   :  { %2540 = vmatpush3.bf16.msra.mxu0 %v2699_v61 }
 0x12d   :  { %2562 = vmatpush3.bf16.msra.mxu1 %v2700_v62  ;;  %2541 = vmatprep.subr.bf16.mxu0 %v2701_v63 }
 0x12e   :  { %2563 = vmatprep.subr.bf16.mxu1 %v2702_v0 }
 0x130   :  { %2542 = vmatpush3.bf16.msra.mxu0 %v2703_v1 }
 0x131   :  { %2564 = vmatpush3.bf16.msra.mxu1 %v2704_v2  ;;  %2543 = vmatprep.subr.bf16.mxu0 %v2705_v3 }
 0x132   :  { %2565 = vmatprep.subr.bf16.mxu1 %v2706_v4 }
 0x134   :  { %2544 = vmatpush3.bf16.msra.mxu0 %v2707_v5 }
 0x135   :  { %2566 = vmatpush3.bf16.msra.mxu1 %v2708_v6  ;;  %2545 = vmatprep.subr.bf16.mxu0 %v2709_v10 }
 0x136   :  { %2567 = vmatprep.subr.bf16.mxu1 %v2710_v12 }
 0x138   :  { %2546 = vmatpush3.bf16.msra.mxu0 %v2711_v13 }
 0x139   :  { %2568 = vmatpush3.bf16.msra.mxu1 %v2712_v14  ;;  %2547 = vmatprep.subr.bf16.mxu0 %v2713_v15 }
 0x13a   :  { %2569 = vmatprep.subr.bf16.mxu1 %v2714_v18 }
 0x13c   :  { %2548 = vmatpush3.bf16.msra.mxu0 %v2715_v19  ;;  %v2333_v19 = vld [vmem:[%s3446_s1 + $0xb0] sm:$0xff] }
 0x13d   :  { %2570 = vmatpush3.bf16.msra.mxu1 %v2716_v7  ;;  %2549 = vmatprep.subr.bf16.mxu0 %v2717_v9  ;;  %v2335_v7 = vld [vmem:[%s3446_s1 + $0xf0] sm:$0xff]  ;;  %v2334_v9 = vld [vmem:[%s3446_s1 + $0xb8] sm:$0xff] }
 0x13e   :  { %2571 = vmatprep.subr.bf16.mxu1 %v2718_v21  ;;  %v2336_v21 = vld [vmem:[%s3446_s1 + $0xf8] sm:$0xff] }
 0x140   :  { %2550 = vmatpush3.bf16.msra.mxu0 %v2719_v22 }
 0x141   :  { %2572 = vmatpush3.bf16.msra.mxu1 %v2720_v23  ;;  %1595 = vmatprep.subr.bf16.mxu0 %v2339_v28  ;;  %v2343_v28 = vcombine.high %v2333_v19, %v2335_v7 }
 0x142   :  { %1636 = vmatprep.subr.bf16.mxu1 %v2341_v32 }
 0x1ce   :  { %v2463_v33 = vpop.f32.mrb[8].mxu0 }
 0x1cf   :  { %v2485_v34 = vpop.f32.mrb[8].mxu1  ;;  %v2464_v35 = vpop.f32.mrb[9].mxu0 }
 0x1d0   :  { %v2465_v36 = vadd.f32 %v2464_v35, %v2463_v33  ;;  %v2486_v37 = vpop.f32.mrb[9].mxu1  ;;  %v2466_v38 = vpop.f32.mrb[10].mxu0  ;;  %v2345_v33 = vcombine.high %v2334_v9, %v2336_v21  ;;  %v2342_v35 = vcombine.low %v2333_v19, %v2335_v7 }
 0x1d1   :  { %v2487_v39 = vadd.f32 %v2486_v37, %v2485_v34  ;;  %v2488_v40 = vpop.f32.mrb[10].mxu1  ;;  %v2467_v41 = vpop.f32.mrb[11].mxu0  ;;  %v2721_v37 = vld [vmem:[%s3448_s3 + $0x340] sm:$0xff]  }
 0x1d2   :  { %v2489_v42 = vpop.f32.mrb[11].mxu1  ;;  %v2722_v38 = vld [vmem:[%s3448_s3 + $0x3c0] sm:$0xff]   ;;  %v2732_v40 = vld [vmem:[%s3448_s3 + $0x390] sm:$0xff]   ;;  %v2733_v41 = vld [vmem:[%s3448_s3 + $0x358] sm:$0xff]  }
 0x1d3   :  { %v746_v43 = vadd.f32 %v2487_v39, %v2465_v36  ;;  %v2344_v36 = vcombine.low %v2334_v9, %v2336_v21  ;;  %v2731_v39 = vld [vmem:[%s3448_s3 + $0x310] sm:$0xff]   ;;  %v2734_v42 = vld [vmem:[%s3448_s3 + $0x3d8] sm:$0xff]  }
 0x1ee   :  { %v2507_v44 = vpop.f32.mrb[12].mxu0 }
 0x1ef   :  { %v2529_v45 = vpop.f32.mrb[12].mxu1  ;;  %v2508_v46 = vpop.f32.mrb[13].mxu0 }
 0x1f0   :  { %v2509_v47 = vadd.f32 %v2508_v46, %v2507_v44  ;;  %v2530_v48 = vpop.f32.mrb[13].mxu1  ;;  %v2510_v49 = vpop.f32.mrb[14].mxu0  ;;  %v2736_v44 = vld [vmem:[%s3448_s3 + $0x398] sm:$0xff]   ;;  %v2738_v46 = vld [vmem:[%s3448_s3 + $0x3e0] sm:$0xff]  }
 0x1f1   :  { %v2531_v51 = vadd.f32 %v2530_v48, %v2529_v45  ;;  %v2532_v52 = vpop.f32.mrb[14].mxu1  ;;  %v2511_v53 = vpop.f32.mrb[15].mxu0  ;;  %v2737_v45 = vld [vmem:[%s3448_s3 + $0x360] sm:$0xff]   ;;  %v2741_v49 = vld [vmem:[%s3448_s3 + $0x368] sm:$0xff]  }
 0x1f2   :  { %v978_v54 = vadd.f32 %v2509_v47, %v746_v43  ;;  %v2533_v55 = vpop.f32.mrb[15].mxu1  ;;  %v2735_v43 = vld [vmem:[%s3448_s3 + $0x318] sm:$0xff]   ;;  %v2739_v47 = vld [vmem:[%s3448_s3 + $0x320] sm:$0xff]   ;;  %v2744_v52 = vld [vmem:[%s3448_s3 + $0x3a8] sm:$0xff]  }
 0x1f3   :  { %v2740_v48 = vld [vmem:[%s3448_s3 + $0x3a0] sm:$0xff]   ;;  %v2745_v53 = vld [vmem:[%s3448_s3 + $0x370] sm:$0xff]  }
 0x1f4   :  { %v3294_v57 = vadd.f32 %v2531_v51, %v978_v54  ;;  %v2743_v51 = vld [vmem:[%s3448_s3 + $0x328] sm:$0xff]   ;;  %v2746_v54 = vld [vmem:[%s3448_s3 + $0x3f0] sm:$0xff]  }
 0x1f5   :  { %v2747_v55 = vld [vmem:[%s3448_s3 + $0x330] sm:$0xff]  }
 0x1f6   :  { %v1129_v61 = vpop.f32.mrb[16].mxu0 }
 0x1f7   :  { %v1130_v62 = vadd.f32 %v1129_v61, %v1038_v56  ;;  %v1170_v63 = vpop.f32.mrb[16].mxu1  ;;  %v1131_v0 = vpop.f32.mrb[17].mxu0  ;;  %v2748_v56 = vld [vmem:[%s3448_s3 + $0x3b0] sm:$0xff]   ;;  %v2752_v61 = vld [vmem:[%s3448_s3 + $0x3b8] sm:$0xff]  }
 0x1f8   :  { %v1171_v1 = vadd.f32 %v1170_v63, %v1046_v58  ;;  %v1132_v2 = vadd.f32 %v1131_v0, %v1042_v59  ;;  %v1172_v3 = vpop.f32.mrb[17].mxu1  ;;  %v1133_v4 = vpop.f32.mrb[18].mxu0  ;;  %v2749_v58 = vld [vmem:[%s3448_s3 + $0x378] sm:$0xff]  }
 0x1f9   :  { %v1177_v5 = vpack.c.bf16 %v1130_v62, %v1130_v62  ;;  %v1173_v6 = vadd.f32 %v1172_v3, %v1050_v60  ;;  %v1174_v10 = vpop.f32.mrb[18].mxu1  ;;  %v1134_v12 = vpop.f32.mrb[19].mxu0  ;;  %v2750_v59 = vld [vmem:[%s3448_s3 + $0x3f8] sm:$0xff]   ;;  %v2337_v4 = vld [vmem:[%s3447_s2 + $0xc] sm:$0xf] }
 0x1fa   :  { %v1178_v13 = vpack.c.bf16 %v1132_v2, %v1132_v2  ;;  %v1175_v14 = vpop.f32.mrb[19].mxu1  ;;  %v1179_v15 = vpack.c.bf16 %v1171_v1, %v1171_v1  ;;  %v2751_v60 = vld [vmem:[%s3448_s3 + $0x338] sm:$0xff]   ;;  %v1550_v7 = vrot.slane %v2337_v4, %v3028_v17 }
 0x1fb   :  { %v1180_v18 = vpack.c.bf16 %v1173_v6, %v1173_v6  ;;  %2769 = vtanh.bf16 %v1177_v5  ;;  %v1538_v14 = vrot.slane %v2337_v4, %v3026_v16 }
 0x1fc   :  { %2771 = vtanh.bf16 %v1178_v13 }
 0x1fd   :  { %2773 = vtanh.bf16 %v1180_v18  ;;  %v1542_v18 = vrot.slane %v2337_v4, %v3016_v11 }
 0x1fe   :  { %2775 = vtanh.bf16 %v1179_v15  ;;  %v1546_v15 = vrot.slane %v2337_v4, %v3030_v20 }
 0x206   :  { %v2770_v22 = vpop.eup %2769 }
 0x207   :  { %v2772_v23 = vpop.eup %2771 }
 0x208   :  { %v2774_v32 = vpop.eup %2773  ;;  %1474 = vmatprep.mubr.bf16.mxu0 %v2772_v23 }
 0x209   :  { %v2776_v34 = vpop.eup %2775  ;;  %1514 = vmatprep.mubr.bf16.mxu1 %v2774_v32  ;;  %1475 = vmatmul.mubr.bf16.vlgmr.msra.gmra.mrb[20].mxu0 %v2770_v22 }
 0x20a   :  { %1515 = vmatmul.mubr.bf16.vlgmr.msra.gmra.mrb[20].mxu1 %v2776_v34  ;;  %1596 = vmatpush1.bf16.msra.mxu0 %v2338_v30  ;;  %v2728_v30 = vld [vmem:[%s3448_s3 + $0x388] sm:$0xff]  }
 0x20b   :  { %1637 = vmatpush1.bf16.msra.mxu1 %v2340_v31  ;;  %1597 = vmatprep.subr.bf16.mxu0 %v2343_v28  ;;  %v2729_v31 = vld [vmem:[%s3448_s3 + $0x350] sm:$0xff]  }
 0x20c   :  { %1638 = vmatprep.subr.bf16.mxu1 %v2345_v33  ;;  %1627 = vmatprep.mubr.bf16.mxu0 %v2813_v8 }
 0x20d   :  { %1668 = vmatprep.mubr.bf16.mxu1 %v2813_v8  ;;  %v2726_v8 = vld [vmem:[%s3448_s3 + $0x3c8] sm:$0xff]  }
 0x20e   :  { %1598 = vmatpush1.bf16.msra.mxu0 %v2342_v35 }
 0x20f   :  { %1639 = vmatpush1.bf16.msra.mxu1 %v2344_v36  ;;  %2579 = vmatprep.subr.bf16.mxu0 %v2721_v37 }
 0x210   :  { %2601 = vmatprep.subr.bf16.mxu1 %v2722_v38 }
 0x211   :  { %2346 = vmatmul.mubr.msk.bf16.vlgmr.msra.gmra.mrb[24].mxu0 %vm94_vm0, %v2895_v27 }
 0x212   :  { %2347 = vmatmul.mubr.msk.bf16.vlgmr.msra.gmra.mrb[24].mxu1 %vm94_vm0, %v2895_v27  ;;  %2580 = vmatpush3.bf16.msra.mxu0 %v2723_v24  ;;  %v2730_v27 = vld [vmem:[%s3448_s3 + $0x3d0] sm:$0xff]  }
 0x213   :  { %2602 = vmatpush3.bf16.msra.mxu1 %v2724_v25  ;;  %2581 = vmatprep.subr.bf16.mxu0 %v2725_v26 }
 0x214   :  { %2603 = vmatprep.subr.bf16.mxu1 %v2726_v8 }
 0x216   :  { %2582 = vmatpush3.bf16.msra.mxu0 %v2727_v29 }
 0x217   :  { %2604 = vmatpush3.bf16.msra.mxu1 %v2728_v30  ;;  %2583 = vmatprep.subr.bf16.mxu0 %v2729_v31 }
 0x218   :  { %2605 = vmatprep.subr.bf16.mxu1 %v2730_v27 }
 0x21a   :  { %2584 = vmatpush3.bf16.msra.mxu0 %v2731_v39 }
 0x21b   :  { %2606 = vmatpush3.bf16.msra.mxu1 %v2732_v40  ;;  %2585 = vmatprep.subr.bf16.mxu0 %v2733_v41 }
 0x21c   :  { %2607 = vmatprep.subr.bf16.mxu1 %v2734_v42 }
 0x21e   :  { %2586 = vmatpush3.bf16.msra.mxu0 %v2735_v43 }
 0x21f   :  { %2608 = vmatpush3.bf16.msra.mxu1 %v2736_v44  ;;  %2587 = vmatprep.subr.bf16.mxu0 %v2737_v45  ;;  %v2444_v45 = vld [vmem:[%s3449_s4] ss:$0 sm:$0xff] }
 0x220   :  { %2609 = vmatprep.subr.bf16.mxu1 %v2738_v46 }
 0x222   :  { %2588 = vmatpush3.bf16.msra.mxu0 %v2739_v47 }
 0x223   :  { %2610 = vmatpush3.bf16.msra.mxu1 %v2740_v48  ;;  %2589 = vmatprep.subr.bf16.mxu0 %v2741_v49 }
 0x224   :  { %2611 = vmatprep.subr.bf16.mxu1 %v2742_v50 }
 0x226   :  { %2590 = vmatpush3.bf16.msra.mxu0 %v2743_v51  ;;  %v2446_v51 = vld [vmem:[%s3449_s4 + $0x1] ss:$0 sm:$0xff] }
 0x227   :  { %2612 = vmatpush3.bf16.msra.mxu1 %v2744_v52  ;;  %2591 = vmatprep.subr.bf16.mxu0 %v2745_v53 }
 0x228   :  { %2613 = vmatprep.subr.bf16.mxu1 %v2746_v54 }
 0x22a   :  { %2592 = vmatpush3.bf16.msra.mxu0 %v2747_v55 }
 0x22b   :  { %2614 = vmatpush3.bf16.msra.mxu1 %v2748_v56  ;;  %2593 = vmatprep.subr.bf16.mxu0 %v2749_v58 }
 0x22c   :  { %2615 = vmatprep.subr.bf16.mxu1 %v2750_v59 }
 0x22e   :  { %2594 = vmatpush3.bf16.msra.mxu0 %v2751_v60 }
 0x22f   :  { %2616 = vmatpush3.bf16.msra.mxu1 %v2752_v61 }
 0x2dc   :  { %v2551_v62 = vpop.f32.mrb[20].mxu0 }
 0x2dd   :  { %v2573_v63 = vpop.f32.mrb[20].mxu1  ;;  %v2552_v0 = vpop.f32.mrb[21].mxu0 }
 0x2de   :  { %v2553_v1 = vadd.f32 %v2552_v0, %v2551_v62  ;;  %v2574_v2 = vpop.f32.mrb[21].mxu1  ;;  %v2554_v3 = vpop.f32.mrb[22].mxu0 }
 0x2df   :  { %v2575_v5 = vadd.f32 %v2574_v2, %v2573_v63  ;;  %v2576_v6 = vpop.f32.mrb[22].mxu1  ;;  %v2555_v10 = vpop.f32.mrb[23].mxu0 }
 0x2e0   :  { %v2577_v12 = vpop.f32.mrb[23].mxu1 }
 0x2e1   :  { %v1517_v13 = vadd.f32 %v2575_v5, %v2553_v1 }
 0x2e3   :  { %v1522_v19 = vadd.f32 %v1517_v13, %v3294_v57 }
 0x2e4   :  { %v1629_v9 = vpop.f32.mrb[24].mxu0 }
 0x2e5   :  { %v1630_v21 = vadd.f32 %v1629_v9, %v1538_v14  ;;  %v1670_v22 = vpop.f32.mrb[24].mxu1  ;;  %v1631_v23 = vpop.f32.mrb[25].mxu0 }
 0x2e6   :  { %v1671_v28 = vadd.f32 %v1670_v22, %v1546_v15  ;;  %v1632_v32 = vadd.f32 %v1631_v23, %v1542_v18  ;;  %v1672_v33 = vpop.f32.mrb[25].mxu1  ;;  %v1633_v34 = vpop.f32.mrb[26].mxu0 }
 0x2e7   :  { %v1677_v35 = vpack.c.bf16 %v1630_v21, %v1630_v21  ;;  %v1673_v36 = vadd.f32 %v1672_v33, %v1550_v7  ;;  %v1674_v37 = vpop.f32.mrb[26].mxu1  ;;  %v1634_v16 = vpop.f32.mrb[27].mxu0 }
 0x2e8   :  { %v1678_v38 = vpack.c.bf16 %v1632_v32, %v1632_v32  ;;  %v1675_v20 = vpop.f32.mrb[27].mxu1  ;;  %v1679_v24 = vpack.c.bf16 %v1671_v28, %v1671_v28 }
 0x2e9   :  { %v1680_v11 = vpack.c.bf16 %v1673_v36, %v1673_v36  ;;  %2777 = vtanh.bf16 %v1677_v35 }
 0x2ea   :  { %2779 = vtanh.bf16 %v1678_v38 }
 0x2eb   :  { %2781 = vtanh.bf16 %v1680_v11 }
 0x2ec   :  { %2783 = vtanh.bf16 %v1679_v24 }
 0x2f4   :  { %v2778_v17 = vpop.eup %2777 }
 0x2f5   :  { %v2780_v57 = vpop.eup %2779 }
 0x2f6   :  { %v2782_v25 = vpop.eup %2781  ;;  %1974 = vmatprep.mubr.bf16.mxu0 %v2780_v57 }
 0x2f7   :  { %v2784_v26 = vpop.eup %2783  ;;  %2014 = vmatprep.mubr.bf16.mxu1 %v2782_v25  ;;  %1975 = vmatmul.mubr.bf16.vlgmr.msra.gmra.mrb[28].mxu0 %v2778_v17 }
 0x2f8   :  { %2015 = vmatmul.mubr.bf16.vlgmr.msra.gmra.mrb[28].mxu1 %v2784_v26 }
 0x3ca   :  { %v2595_v8 = vpop.f32.mrb[28].mxu0 }
 0x3cb   :  { %v2617_v29 = vpop.f32.mrb[28].mxu1  ;;  %v2596_v30 = vpop.f32.mrb[29].mxu0 }
 0x3cc   :  { %v2597_v31 = vadd.f32 %v2596_v30, %v2595_v8  ;;  %v2618_v27 = vpop.f32.mrb[29].mxu1  ;;  %v2598_v39 = vpop.f32.mrb[30].mxu0 }
 0x3cd   :  { %v2619_v40 = vadd.f32 %v2618_v27, %v2617_v29  ;;  %v2620_v41 = vpop.f32.mrb[30].mxu1  ;;  %v2599_v42 = vpop.f32.mrb[31].mxu0 }
 0x3ce   :  { %v2621_v43 = vpop.f32.mrb[31].mxu1 }
 0x3cf   :  { %v2017_v44 = vadd.f32 %v2619_v40, %v2597_v31 }
 0x3d1   :  { %v2022_v46 = vadd.f32 %v2017_v44, %v1522_v19 }
 0x3d3   :  { %v2028_v47 = vadd.f32 %v2444_v45, %v2022_v46 }
 0x3d5   :  { %v2445_v48 = vmul.f32 -1.442695, %v2028_v47 }
 0x3d7   :  { %2785 = vpow2.f32 %v2445_v48 }
 0x3e1   :  { %v2786_v49 = vpop.eup %2785 }
 0x3e2   :  { %v2032_v50 = vadd.f32 1.0, %v2786_v49 }
 0x3e4   :  { %2787 = vrcp.f32 %v2032_v50 }
 0x3ee   :  { %v2788_v52 = vpop.eup %2787 }
 0x3ef   :  { %v2040_v53 = vsub.f32 %v2788_v52, %v2446_v51 }
 0x3f1   :  { %2042 = vst.msk [vmem:[#allocation2] sm:$0xff] %vm2041_vm1, %v2040_v53 }
 0x3f2   :  { %2800 = shalt.err (!%p2797_p4)
}
 0x3f3   :  { %s2801_s15 = scalar_lea.hbm %s3450_s5, 128 }
 0x3f4   :  { %p2802_p5 = scmp.ne.s32.totalorder %s3450_s5, %s2801_s15  ;;  %p2805_p6 = scmp.lt.u32.totalorder %s2801_s15, %s3450_s5 }
 0x3f6   :  { %p2807_p7 = pnand %p2805_p6, %p2802_p5 }
 0x3f8   :  { %2810 = shalt.err (!%p2807_p7)
}
 0x3f9   :  { %2052 = dma.vmem_to_hbm [thread:$0]  %s2050_s11, 128, %s3450_s5, [#allocation3]  }
 0x3fa   :  { %2811 = dma.done.wait [#allocation3], 128  }
 0x3fb   :  { %2812 = vsyncadd [#allocation3], 4294967168 }
 0x3fc   :  { %2056 = vsyncpa [#allocation3], 1 }

</bundles_post_ra>
